<compile_context>
chip_gen: v6e
topology: v6e:2x2x1
jax: 0.10.0
libtpu: 0.0.40
codegen_flags: <defaults>
</compile_context>

<pallas_src>
import functools
import math

import jax
import jax.numpy as jnp
from jax import lax
from jax.experimental import pallas as pl
from jax.experimental.pallas import tpu as pltpu


def _round_up(x, m):
    return ((x + m - 1) // m) * m


def _feature_tile(h):
    """Lane-legal tile for a feature axis of size h (multiple of 128, or full dim)."""
    for t in (256, 128):
        if h % t == 0:
            return t
    return h  # small / unaligned: full dim is legal when block == array dim


def split_linear_kernel(x_ref, w_ref, b_ref, o_ref, acc_ref):
    """One (tm, tn) output tile of relu(x @ W.T + b), reduced over K tiles.

    x_ref  : (tm, tk)  rows of the reshaped (2B, H) input
    w_ref  : (tn, tk)  torch-layout (out, in) weight tile
    b_ref  : (1, tn)   bias tile
    o_ref  : (tm, tn)  output tile
    acc_ref: (tm, tn)  f32 accumulator scratch (resident across the K axis)
    """
    k = pl.program_id(2)

    @pl.when(k == 0)
    def _():
        acc_ref[...] = jnp.zeros_like(acc_ref)

    # x @ W.T without materializing a transpose: contract last dims of both.
    acc_ref[...] += lax.dot_general(
        x_ref[...], w_ref[...],
        dimension_numbers=(((1,), (1,)), ((), ())),
        preferred_element_type=jnp.float32)

    @pl.when(k == pl.num_programs(2) - 1)
    def _():
        y = acc_ref[...] + b_ref[...].astype(jnp.float32)
        o_ref[...] = jnp.maximum(y, 0.0).astype(o_ref.dtype)


@functools.partial(jax.jit, static_argnames=("tm_max",))
def split_linear(x, w, b, *, tm_max=512):
    """x: (B, D) f32, w: (H, H) torch-style (out, in), b: (H,), H = D // 2."""
    B, D = x.shape
    H = D // 2
    assert D % 2 == 0, f"feature dim {D} must be even"
    assert w.shape == (H, H)
    assert b.shape == (H,)

    # Fuse the split: free row-major reshape -> lane-dense (2B, H) operand that
    # shares one weight/bias, feeding a single MXU stream.
    M = 2 * B
    xr = x.reshape(M, H)

    tn = _feature_tile(H)                      # output-feature (N) tile
    tk = _feature_tile(H)                      # reduction (K) tile
    tm = min(tm_max, _round_up(M, 8))          # sublane-aligned row tile
    Mp = _round_up(M, tm)
    if Mp != M:
        xr = jnp.pad(xr, ((0, Mp - M), (0, 0)))

    b2 = b.reshape(1, H)
    grid = (Mp // tm, H // tn, H // tk)

    itemsize = jnp.dtype(x.dtype).itemsize
    cost = pl.CostEstimate(
        flops=2 * Mp * H * H,
        transcendentals=0,
        bytes_accessed=int(Mp * H * itemsize          # x
                           + H * H * itemsize         # w
                           + H * itemsize             # b
                           + Mp * H * itemsize))      # out

    yp = pl.pallas_call(
        split_linear_kernel,
        out_shape=jax.ShapeDtypeStruct((Mp, H), x.dtype),
        grid_spec=pltpu.PrefetchScalarGridSpec(
            num_scalar_prefetch=0,
            grid=grid,
            in_specs=[
                pl.BlockSpec((tm, tk), lambda i, j, k: (i, k)),   # x rows
                pl.BlockSpec((tn, tk), lambda i, j, k: (j, k)),   # W (out, in)
                pl.BlockSpec((1, tn), lambda i, j, k: (0, j)),    # bias
            ],
            out_specs=pl.BlockSpec((tm, tn), lambda i, j, k: (i, j)),
            scratch_shapes=[pltpu.VMEM((tm, tn), jnp.float32)],
        ),
        compiler_params=pltpu.CompilerParams(
            # M/N independent -> shard across v7x's 2 TensorCores (no-op on
            # single-TC v5e/v6e); K carries the accumulator -> "arbitrary".
            dimension_semantics=("parallel", "parallel", "arbitrary"),
            # Double-buffered tiles above stay under ~4 MiB; 32 MiB gives
            # headroom on v5e/v6e (128 MiB physical) and v7x (64 MiB physical).
            vmem_limit_bytes=32 * 1024 * 1024,
        ),
        cost_estimate=cost,
    )(xr, w, b2)

    # Drop the row padding and undo the free (2B, H) -> (B, D) reshape.
    return yp[:M].reshape(B, D)


if __name__ == "__main__":
    # Small shapes consistent with the module: batch=2, input_dim (hidden)=32.
    B, D = 2, 32
    H = D // 2

    key = jax.random.PRNGKey(0)
    kx, kw, kb = jax.random.split(key, 3)

    x = jax.random.normal(kx, (B, D), dtype=jnp.float32)

    # he initialization: randn * sqrt(2/in); square layer so (out,in)==(in,out).
    he_std = math.sqrt(2.0 / H)
    w = jax.random.normal(kw, (H, H), dtype=jnp.float32) * he_std
    # nn.Linear default bias init: U(-1/sqrt(in), +1/sqrt(in)).
    bound = 1.0 / math.sqrt(H)
    b = jax.random.uniform(kb, (H,), dtype=jnp.float32, minval=-bound, maxval=bound)

    out = jax.block_until_ready(split_linear(x, w, b))

    # Pure-JAX reference for correctness.
    x1, x2 = x[:, :H], x[:, H:]
    ref = jnp.concatenate(
        [jnp.maximum(x1 @ w.T + b, 0.0), jnp.maximum(x2 @ w.T + b, 0.0)], axis=-1)

    # TODO(synk): verbose=True host-side tensor printing from the module is debug-only
    # and intentionally not reproduced inside the kernel.
    assert out.shape == (B, D)
    assert jnp.allclose(out, ref, atol=1e-5, rtol=1e-5), "mismatch vs reference"

    print("KERNEL_OK")
</pallas_src>

<mosaic_0001>
module attributes {stable_mosaic.version = 11 : i64} {
  func.func @split_linear_kernel(%arg0: i32, %arg1: i32, %arg2: i32, %arg3: memref<8x16xf32, #tpu.memory_space<vmem>>, %arg4: memref<16x16xf32, #tpu.memory_space<vmem>>, %arg5: memref<1x16xf32, #tpu.memory_space<vmem>>, %arg6: memref<8x16xf32, #tpu.memory_space<vmem>>, %arg7: memref<8x16xf32, #tpu.memory_space<vmem>>) attributes {dimension_semantics = [#tpu.dimension_semantics<parallel>, #tpu.dimension_semantics<parallel>, #tpu.dimension_semantics<arbitrary>], iteration_bounds = array<i64: 1, 1, 1>, scalar_prefetch = 0 : i64, scratch_operands = 1 : i64, tpu.core_type = #tpu.core_type<tc>, window_params = [{transform_indices = @transform_0, window_bounds = array<i64: 8, 16>}, {transform_indices = @transform_1, window_bounds = array<i64: 16, 16>}, {transform_indices = @transform_2, window_bounds = array<i64: 1, 16>}, {transform_indices = @transform_3, window_bounds = array<i64: 8, 16>}]} {
    %c0_i32 = arith.constant 0 : i32
    %0 = arith.cmpi eq, %arg2, %c0_i32 : i32
    %1 = arith.extui %0 : i1 to i32
    %c0_i32_0 = arith.constant 0 : i32
    %2 = arith.cmpi ne, %1, %c0_i32_0 : i32
    scf.if %2 {
      %cst_10 = arith.constant 0.000000e+00 : f32
      %12 = vector.broadcast %cst_10 : f32 to vector<8x16xf32>
      %c0_11 = arith.constant 0 : index
      %c0_12 = arith.constant 0 : index
      %13 = vector.load %arg7[%c0_11, %c0_12] : memref<8x16xf32, #tpu.memory_space<vmem>>, vector<8x16xf32>
      tpu.vector_store %arg7[%c0_11, %c0_12], %12 {strides = array<i32>} : memref<8x16xf32, #tpu.memory_space<vmem>>, vector<8x16xf32>,
    } else {
    }
    %c0 = arith.constant 0 : index
    %c0_1 = arith.constant 0 : index
    %3 = vector.load %arg7[%c0, %c0_1] : memref<8x16xf32, #tpu.memory_space<vmem>>, vector<8x16xf32>
    %c0_2 = arith.constant 0 : index
    %c0_3 = arith.constant 0 : index
    %4 = vector.load %arg3[%c0_2, %c0_3] : memref<8x16xf32, #tpu.memory_space<vmem>>, vector<8x16xf32>
    %c0_4 = arith.constant 0 : index
    %c0_5 = arith.constant 0 : index
    %5 = vector.load %arg4[%c0_4, %c0_5] : memref<16x16xf32, #tpu.memory_space<vmem>>, vector<16x16xf32>
    %cst = arith.constant dense<0.000000e+00> : vector<8x16xf32>
    %6 = tpu.matmul %4, %5, %cst {dimension_numbers = #tpu.dot_dimension_numbers<[1], [1], [0], [0], [0, 0, 1, 0], [], []>} : vector<8x16xf32>, vector<16x16xf32>, vector<8x16xf32> -> vector<8x16xf32>
    %7 = arith.addf %3, %6 : vector<8x16xf32>
    %c0_6 = arith.constant 0 : index
    %c0_7 = arith.constant 0 : index
    %8 = vector.load %arg7[%c0_6, %c0_7] : memref<8x16xf32, #tpu.memory_space<vmem>>, vector<8x16xf32>
    tpu.vector_store %arg7[%c0_6, %c0_7], %7 {strides = array<i32>} : memref<8x16xf32, #tpu.memory_space<vmem>>, vector<8x16xf32>,
    %c0_i32_8 = arith.constant 0 : i32
    %9 = arith.cmpi eq, %arg2, %c0_i32_8 : i32
    %10 = arith.extui %9 : i1 to i32
    %c0_i32_9 = arith.constant 0 : i32
    %11 = arith.cmpi ne, %10, %c0_i32_9 : i32
    scf.if %11 {
      %c0_10 = arith.constant 0 : index
      %c0_11 = arith.constant 0 : index
      %12 = vector.load %arg7[%c0_10, %c0_11] : memref<8x16xf32, #tpu.memory_space<vmem>>, vector<8x16xf32>
      %c0_12 = arith.constant 0 : index
      %c0_13 = arith.constant 0 : index
      %13 = vector.load %arg5[%c0_12, %c0_13] : memref<1x16xf32, #tpu.memory_space<vmem>>, vector<1x16xf32>
      %14 = vector.broadcast %13 : vector<1x16xf32> to vector<8x16xf32>
      %15 = arith.addf %12, %14 : vector<8x16xf32>
      %cst_14 = arith.constant 0.000000e+00 : f32
      %16 = vector.broadcast %cst_14 : f32 to vector<8x16xf32>
      %17 = arith.maximumf %15, %16 : vector<8x16xf32>
      %c0_15 = arith.constant 0 : index
      %c0_16 = arith.constant 0 : index
      %18 = vector.load %arg6[%c0_15, %c0_16] : memref<8x16xf32, #tpu.memory_space<vmem>>, vector<8x16xf32>
      tpu.vector_store %arg6[%c0_15, %c0_16], %17 {strides = array<i32>} : memref<8x16xf32, #tpu.memory_space<vmem>>, vector<8x16xf32>,
    } else {
    }
    return
  }
  func.func @transform_0(%arg0: i32, %arg1: i32, %arg2: i32) -> (i32, i32) {
    %c0_i32 = arith.constant 0 : i32
    return %arg0, %arg2 : i32, i32
  }
  func.func @transform_1(%arg0: i32, %arg1: i32, %arg2: i32) -> (i32, i32) {
    %c0_i32 = arith.constant 0 : i32
    return %arg1, %arg2 : i32, i32
  }
  func.func @transform_2(%arg0: i32, %arg1: i32, %arg2: i32) -> (i32, i32) {
    %c0_i32 = arith.constant 0 : i32
    %c0_i32_0 = arith.constant 0 : i32
    return %c0_i32, %arg1 : i32, i32
  }
  func.func @transform_3(%arg0: i32, %arg1: i32, %arg2: i32) -> (i32, i32) {
    %c0_i32 = arith.constant 0 : i32
    return %arg0, %arg1 : i32, i32
  }
}

</mosaic_0001>

<bundles_post_ra>
// kernel: split_linear.1
= control target key start
LH: loop header
LB: loop body
LE: loop exit
PB: predicated region body
PF: predicated region fallthrough
CT: control target
= control target key end

     0   :  { %vm18_vm0 = vcmask 130048   ;;  %v140_v0 = vmov 0.0   ;;  %vm141_vm1 = vmmov 0   ;;  %s183_s1 = inlined_call_operand.vmem [shape: f32[16,16], index: 1, kind: input, shape index: {}]   ;;  %s184_s0 = inlined_call_operand.vmem [shape: f32[8,16], index: 0, kind: input, shape index: {}]   ;;  %s185_s2 = inlined_call_operand.vmem [shape: f32[1,16], index: 2, kind: input, shape index: {}]   ;;  %s186_s3 = inlined_call_operand.vmem [shape: f32[8,16], index: 3, kind: output, shape index: {}]  }
   0x1   :  { %19 = vst.msk [vmem:[#allocation2] sm:$0xff] %vm18_vm0, %v140_v0  ;;  %131 = vmatprep.subr.mxu0 %v140_v0  ;;  %v23_v1 = vld [vmem:[%s183_s1 + $0x8] sm:$0xff]  ;;  %135 = vmatprep.mubr.msk.f32.mxu0 %vm141_vm1, %v140_v0  ;;  %v22_v2 = vld [vmem:[%s183_s1] sm:$0xff] }
   0x2   :  { %132 = vmatpush3.xpose.msk.msra.mxu0 %vm18_vm0, %v23_v1  ;;  %v21_v3 = vld [vmem:[%s184_s0] sm:$0xff] }
   0x3   :  { %133 = vmatprep.subr.mxu0 %v140_v0  ;;  %v127_v8 = vld [vmem:[%s185_s2] ss:$0 sm:$0xff] }
   0x6   :  { %134 = vmatpush3.xpose.msk.msra.mxu0 %vm18_vm0, %v22_v2 }
   0x8   :  { %v20_v4 = vld [vmem:[#allocation2] sm:$0xff] }
   0x9   :  { %136 = vmatmul.mubr.msk.f32.vlgmr.msra.gmra.mxu0 %vm18_vm0, %v21_v3 }
  0xc9   :  { %v100_v5 = vpop.f32.mrf.mxu0 }
  0xca   :  { %v104_v6 = vadd.f32 %v100_v5, %v20_v4 }
  0xcb   :  { %v137_v7 = vpop.f32.mrf.mxu0 }
  0xcc   :  { %105 = vst.msk [vmem:[#allocation2] sm:$0xff] %vm18_vm0, %v104_v6 }
  0xd3   :  { %v109_v9 = vld [vmem:[#allocation2] sm:$0xff] }
  0xd4   :  { %v117_v10 = vadd.f32 %v127_v8, %v109_v9 }
  0xd6   :  { %v118_v11 = vmax.f32 %v117_v10, 0.0 }
  0xd8   :  { %119 = vst.msk [vmem:[%s186_s3] sm:$0xff] %vm18_vm0, %v118_v11 }

</bundles_post_ra>
